<compile_context>
chip_gen: v7x
topology: tpu7x:2x2x1
jax: 0.10.0
libtpu: 0.0.40
codegen_flags: <defaults>
</compile_context>

<pallas_src>
import functools

import jax
import jax.numpy as jnp
from jax.experimental import pallas as pl
from jax.experimental.pallas import tpu as pltpu


def _fused_linear_kernel(x_ref, w_ref, b_ref, o_ref, acc_ref, *, activation):
    """o = act(x @ w + b), accumulated over the K grid axis."""
    k = pl.program_id(2)

    @pl.when(k == 0)
    def _():
        acc_ref[...] = jnp.zeros_like(acc_ref)

    acc_ref[...] += jnp.dot(
        x_ref[...], w_ref[...], preferred_element_type=jnp.float32
    )

    @pl.when(k == pl.num_programs(2) - 1)
    def _():
        y = acc_ref[...] + b_ref[...].astype(jnp.float32)
        if activation == "relu":
            y = jnp.maximum(y, 0.0)
        elif activation == "sigmoid":
            y = jax.nn.sigmoid(y)
        elif activation == "linear":
            pass  # Identity activation
        else:
            raise NotImplementedError(f"activation {activation!r}")
        o_ref[...] = y.astype(o_ref.dtype)


def _pick_tile(dim, target, align):
    """Largest tile <= target that is a multiple of `align` and divides `dim`
    exactly (so the grid has no partial blocks and nothing is padded).
    Falls back to the full extent, which is always a legal block shape."""
    if dim <= target:
        return dim
    t = (target // align) * align
    while t >= align:
        if dim % t == 0:
            return t
        t -= align
    return dim


def fused_linear(x, w, b, activation="relu"):
    """y = act(x @ w + b) with x:(M,K), w:(K,N), b:(N,) via one pallas_call."""
    M, K = x.shape
    Kw, N = w.shape
    assert K == Kw and b.shape == (N,)

    # dtype-aware sublane alignment: 8 for f32, 16 for bf16, 32 for int8/fp8.
    sub = max(8, 32 // jnp.dtype(x.dtype).itemsize)
    tm = _pick_tile(M, 512, sub)    # rows of x / output
    tk = _pick_tile(K, 512, 128)    # reduction dim (lane dim of x)
    tn = _pick_tile(N, 1024, 128)   # lane-dense output width

    grid = (M // tm, N // tn, K // tk)
    b2 = b.reshape(1, N)

    kernel = functools.partial(_fused_linear_kernel, activation=activation)

    return pl.pallas_call(
        kernel,
        out_shape=jax.ShapeDtypeStruct((M, N), x.dtype),
        grid_spec=pltpu.PrefetchScalarGridSpec(
            num_scalar_prefetch=0,
            grid=grid,
            in_specs=[
                pl.BlockSpec((tm, tk), lambda i, j, k: (i, k)),
                pl.BlockSpec((tk, tn), lambda i, j, k: (k, j)),
                pl.BlockSpec((1, tn), lambda i, j, k: (0, j)),
            ],
            out_specs=pl.BlockSpec((tm, tn), lambda i, j, k: (i, j)),
            scratch_shapes=[pltpu.VMEM((tm, tn), jnp.float32)],
        ),
        compiler_params=pltpu.CompilerParams(
            # M/N axes shard across TensorCores (megacore / v7x); K is the
            # sequential reduction axis carrying the accumulator.
            dimension_semantics=("parallel", "parallel", "arbitrary"),
            # Raise the scoped-VMEM limit above the 16 MiB v5e default while
            # staying under the ~48 MiB headroom advised for v7x (64 MiB phys).
            vmem_limit_bytes=48 * 1024 * 1024,
        ),
    )(x, w, b2)


def dnn_forward(x, weights, biases, activation="relu"):
    """DNN.forward: nD input (..., input_dim) -> (..., hidden_units[-1])."""
    lead = x.shape[:-1]
    h = x.reshape(-1, x.shape[-1])
    for w, b in zip(weights, biases):
        h = fused_linear(h, w, b, activation=activation)
        # TODO(synk): training-mode dropout (dropout_rate > 0) and BatchNorm1d
        # (use_bn=True) are not implemented; the module defaults disable both.
    return h.reshape(*lead, weights[-1].shape[-1])


if __name__ == "__main__":
    key = jax.random.PRNGKey(0)

    # Small shapes consistent with DNN: 2-D (batch, input_dim) input.
    batch, inputs_dim = 4, 32
    hidden_units = (64, 32)
    init_std = 0.1  # larger than the module's 1e-4 so the check is non-trivial

    key, kx = jax.random.split(key)
    x = jax.random.normal(kx, (batch, inputs_dim), dtype=jnp.float32)

    dims = [inputs_dim] + list(hidden_units)
    weights, biases = [], []
    for i in range(len(dims) - 1):
        key, kw, kb = jax.random.split(key, 3)
        weights.append(
            init_std * jax.random.normal(kw, (dims[i], dims[i + 1]), jnp.float32)
        )
        biases.append(
            0.01 * jax.random.normal(kb, (dims[i + 1],), jnp.float32)
        )

    y = dnn_forward(x, weights, biases, activation="relu")
    y = jax.block_until_ready(y)

    # Pure-JAX reference of the same forward pass.
    ref = x
    for w, b in zip(weights, biases):
        ref = jnp.maximum(ref @ w + b, 0.0)

    assert y.shape == (batch, hidden_units[-1])
    assert y.dtype == x.dtype
    assert jnp.allclose(y, ref, atol=1e-5, rtol=1e-5)
    print("KERNEL_OK")
</pallas_src>

<mosaic_0001>
module attributes {stable_mosaic.version = 11 : i64} {
  func.func @_fused_linear_kernel(%arg0: i32, %arg1: i32, %arg2: i32, %arg3: memref<4x32xf32, #tpu.memory_space<vmem>>, %arg4: memref<32x64xf32, #tpu.memory_space<vmem>>, %arg5: memref<1x64xf32, #tpu.memory_space<vmem>>, %arg6: memref<4x64xf32, #tpu.memory_space<vmem>>, %arg7: memref<4x64xf32, #tpu.memory_space<vmem>>) attributes {dimension_semantics = [#tpu.dimension_semantics<parallel>, #tpu.dimension_semantics<parallel>, #tpu.dimension_semantics<arbitrary>], iteration_bounds = array<i64: 1, 1, 1>, scalar_prefetch = 0 : i64, scratch_operands = 1 : i64, tpu.core_type = #tpu.core_type<tc>, window_params = [{transform_indices = @transform_0, window_bounds = array<i64: 4, 32>}, {transform_indices = @transform_1, window_bounds = array<i64: 32, 64>}, {transform_indices = @transform_2, window_bounds = array<i64: 1, 64>}, {transform_indices = @transform_3, window_bounds = array<i64: 4, 64>}]} {
    %c0_i32 = arith.constant 0 : i32
    %0 = arith.cmpi eq, %arg2, %c0_i32 : i32
    %1 = arith.extui %0 : i1 to i32
    %c0_i32_0 = arith.constant 0 : i32
    %2 = arith.cmpi ne, %1, %c0_i32_0 : i32
    scf.if %2 {
      %cst_10 = arith.constant 0.000000e+00 : f32
      %12 = vector.broadcast %cst_10 : f32 to vector<4x64xf32>
      %c0_11 = arith.constant 0 : index
      %c0_12 = arith.constant 0 : index
      %13 = vector.load %arg7[%c0_11, %c0_12] : memref<4x64xf32, #tpu.memory_space<vmem>>, vector<4x64xf32>
      tpu.vector_store %arg7[%c0_11, %c0_12], %12 {strides = array<i32>} : memref<4x64xf32, #tpu.memory_space<vmem>>, vector<4x64xf32>,
    } else {
    }
    %c0 = arith.constant 0 : index
    %c0_1 = arith.constant 0 : index
    %3 = vector.load %arg7[%c0, %c0_1] : memref<4x64xf32, #tpu.memory_space<vmem>>, vector<4x64xf32>
    %c0_2 = arith.constant 0 : index
    %c0_3 = arith.constant 0 : index
    %4 = vector.load %arg3[%c0_2, %c0_3] : memref<4x32xf32, #tpu.memory_space<vmem>>, vector<4x32xf32>
    %c0_4 = arith.constant 0 : index
    %c0_5 = arith.constant 0 : index
    %5 = vector.load %arg4[%c0_4, %c0_5] : memref<32x64xf32, #tpu.memory_space<vmem>>, vector<32x64xf32>
    %cst = arith.constant dense<0.000000e+00> : vector<4x64xf32>
    %6 = tpu.matmul %4, %5, %cst {dimension_numbers = #tpu.dot_dimension_numbers<[1], [0], [0], [1], [0, 0, 1, 1], [], []>} : vector<4x32xf32>, vector<32x64xf32>, vector<4x64xf32> -> vector<4x64xf32>
    %7 = arith.addf %3, %6 : vector<4x64xf32>
    %c0_6 = arith.constant 0 : index
    %c0_7 = arith.constant 0 : index
    %8 = vector.load %arg7[%c0_6, %c0_7] : memref<4x64xf32, #tpu.memory_space<vmem>>, vector<4x64xf32>
    tpu.vector_store %arg7[%c0_6, %c0_7], %7 {strides = array<i32>} : memref<4x64xf32, #tpu.memory_space<vmem>>, vector<4x64xf32>,
    %c0_i32_8 = arith.constant 0 : i32
    %9 = arith.cmpi eq, %arg2, %c0_i32_8 : i32
    %10 = arith.extui %9 : i1 to i32
    %c0_i32_9 = arith.constant 0 : i32
    %11 = arith.cmpi ne, %10, %c0_i32_9 : i32
    scf.if %11 {
      %c0_10 = arith.constant 0 : index
      %c0_11 = arith.constant 0 : index
      %12 = vector.load %arg7[%c0_10, %c0_11] : memref<4x64xf32, #tpu.memory_space<vmem>>, vector<4x64xf32>
      %c0_12 = arith.constant 0 : index
      %c0_13 = arith.constant 0 : index
      %13 = vector.load %arg5[%c0_12, %c0_13] : memref<1x64xf32, #tpu.memory_space<vmem>>, vector<1x64xf32>
      %14 = vector.broadcast %13 : vector<1x64xf32> to vector<4x64xf32>
      %15 = arith.addf %12, %14 : vector<4x64xf32>
      %cst_14 = arith.constant 0.000000e+00 : f32
      %16 = vector.broadcast %cst_14 : f32 to vector<4x64xf32>
      %17 = arith.maximumf %15, %16 : vector<4x64xf32>
      %c0_15 = arith.constant 0 : index
      %c0_16 = arith.constant 0 : index
      %18 = vector.load %arg6[%c0_15, %c0_16] : memref<4x64xf32, #tpu.memory_space<vmem>>, vector<4x64xf32>
      tpu.vector_store %arg6[%c0_15, %c0_16], %17 {strides = array<i32>} : memref<4x64xf32, #tpu.memory_space<vmem>>, vector<4x64xf32>,
    } else {
    }
    return
  }
  func.func @transform_0(%arg0: i32, %arg1: i32, %arg2: i32) -> (i32, i32) {
    %c0_i32 = arith.constant 0 : i32
    return %arg0, %arg2 : i32, i32
  }
  func.func @transform_1(%arg0: i32, %arg1: i32, %arg2: i32) -> (i32, i32) {
    %c0_i32 = arith.constant 0 : i32
    return %arg2, %arg1 : i32, i32
  }
  func.func @transform_2(%arg0: i32, %arg1: i32, %arg2: i32) -> (i32, i32) {
    %c0_i32 = arith.constant 0 : i32
    %c0_i32_0 = arith.constant 0 : i32
    return %c0_i32, %arg1 : i32, i32
  }
  func.func @transform_3(%arg0: i32, %arg1: i32, %arg2: i32) -> (i32, i32) {
    %c0_i32 = arith.constant 0 : i32
    return %arg0, %arg1 : i32, i32
  }
}

</mosaic_0001>

<bundles_post_ra>
// kernel: tpu_custom_call.1
= control target key start
LH: loop header
LB: loop body
LE: loop exit
PB: predicated region body
PF: predicated region fallthrough
CT: control target
= control target key end

     0   :  { %8 = vsyncpa [#allocation4], 0  ;;  %s341_s0 = inlined_call_operand.hbm [shape: f32[4,32], index: 0, kind: input, shape index: {}]   ;;  %s342_s1 = inlined_call_operand.hbm [shape: f32[32,64], index: 1, kind: input, shape index: {}]   ;;  %s343_s2 = inlined_call_operand.vmem [shape: f32[1,64], index: 2, kind: input, shape index: {}]   ;;  %s344_s3 = inlined_call_operand.hbm [shape: f32[4,64], index: 3, kind: output, shape index: {}]  }
   0x1   :  { %9 = vsyncpa [#allocation7], 0 }
   0x2   :  { %10 = vsyncpa [#allocation5], 0  ;;  %s264_s12 = smov [#allocation3]   ;;  %s265_s14 = smov [#allocation6]  }
   0x3   :  { %s17_s13 = sshll.u32 %s264_s12, 4  ;;  %s26_s15 = sshll.u32 %s265_s14, 4  ;;  %s18_s13 = int_to_ptr.vmem [resolvable:$true] %s17_s13  ;;  %s292_s15 = int_to_ptr.vmem [resolvable:$true] %s26_s15 }
   0x4   :  { %s192_s18 = scalar_lea.hbm %s341_s0, 64 }
   0x5   :  { %p193_p0 = scmp.ne.s32.totalorder %s341_s0, %s192_s18  ;;  %p196_p1 = scmp.lt.u32.totalorder %s192_s18, %s341_s0 }
   0x7   :  { %p198_p2 = pnand %p196_p1, %p193_p0 }
   0x9   :  { %201 = shalt.err (!%p198_p2)
}
   0xa   :  { %s202_s23 = scalar_lea.vmem %s18_s13, 64  ;;  %p207_p4 = scmp.lt.s32.totalorder %s18_s13, %s18_s13 }
   0xb   :  { %p203_p3 = scmp.ne.s32.totalorder %s18_s13, %s202_s23  ;;  %p208_p5 = scmp.lt.s32.totalorder %s202_s23, %s202_s23 }
   0xd   :  { %p209_p6 = por %p208_p5, %p207_p4 }
   0xf   :  { %p210_p7 = pnand %p209_p6, %p203_p3 }
  0x11   :  { %213 = shalt.err (!%p210_p7)
}
  0x12   :  { %20 = dma.hbm_to_vmem [thread:$0]  %s341_s0, 64, %s18_s13, [#allocation4]  }
  0x13   :  { %s214_s28 = scalar_lea.hbm %s342_s1, 512 }
  0x14   :  { %p215_p8 = scmp.ne.s32.totalorder %s342_s1, %s214_s28  ;;  %p218_p9 = scmp.lt.u32.totalorder %s214_s28, %s342_s1 }
  0x16   :  { %p220_p10 = pnand %p218_p9, %p215_p8 }
  0x18   :  { %223 = shalt.err (!%p220_p10)
}
  0x19   :  { %s224_s6 = scalar_lea.vmem %s292_s15, 512  ;;  %p229_p12 = scmp.lt.s32.totalorder %s292_s15, %s292_s15 }
  0x1a   :  { %p225_p11 = scmp.ne.s32.totalorder %s292_s15, %s224_s6  ;;  %p230_p13 = scmp.lt.s32.totalorder %s224_s6, %s224_s6 }
  0x1c   :  { %p231_p0 = por %p230_p13, %p229_p12 }
  0x1e   :  { %p232_p1 = pnand %p231_p0, %p225_p11 }
  0x20   :  { %235 = shalt.err (!%p232_p1)
}
  0x21   :  { %s266_s0 = smov 128   ;;  %s267_s7 = smov 8  }
  0x22   :  { %32 = dma.hbm_to_vmem [thread:$0]  %s342_s1, 512, %s292_s15, [#allocation7], %s266_s0, %s266_s0, %s267_s7  }
  0x23   :  { %258 = dma.done.wait [#allocation4], 64  }
  0x24   :  { %259 = vsyncadd [#allocation4], 4294967232 }
  0x25   :  { %260 = dma.done.wait [#allocation7], 512  }
  0x26   :  { %261 = vsyncadd [#allocation7], 4294966784  ;;  %vm45_vm0 = vcmask 519168   ;;  %v268_v0 = vmov 0.0|0.0   ;;  %v269_v1 = vmov 0.0   ;;  %vm270_vm1 = vmmov 0  }
  0x27   :  { %178 = vmatprep.subr.bf16.mxu0 %v268_v0  ;;  %46 = vst.msk [vmem:[#allocation2] sm:$0xf] %vm45_vm0, %v269_v1  ;;  %175 = vmatprep.mubr.msk.f32.mxu0 %vm270_vm1, %v269_v1  ;;  %v49_v2 = vld [vmem:[#allocation6] sm:$0xff]  ;;  %v50_v3 = vld [vmem:[#allocation6 + $0x8] sm:$0xff]  ;;  %v51_v4 = vld [vmem:[#allocation6 + $0x10] sm:$0xff]  ;;  %vm53_vm2 = vcmask 261120  }
  0x28   :  { %v179_v5 = vpack.c.bf16 %v50_v3, %v49_v2  ;;  %v52_v6 = vld [vmem:[#allocation6 + $0x18] sm:$0xff]  ;;  %s271_s11 = smov [#allocation8]  }
  0x29   :  { %v182_v7 = vpack.c.bf16 %v52_v6, %v51_v4  ;;  %v48_v8 = vld [vmem:[#allocation3] sm:$0xf]  ;;  %v161_v13 = vld [vmem:[%s343_s2] ss:$0 sm:$0xff]  ;;  %s150_s12 = sshll.u32 %s271_s11, 4  ;;  %s151_s12 = int_to_ptr.vmem [resolvable:$true] %s150_s12 }
  0x2a   :  { %180 = vmatpush3.bf16.msra.mxu0 %v179_v5  ;;  %s236_s13 = scalar_lea.vmem %s151_s12, 64  ;;  %p241_p3 = scmp.lt.s32.totalorder %s151_s12, %s151_s12 }
  0x2b   :  { %181 = vmatprep.subr.bf16.mxu0 %v268_v0  ;;  %p237_p2 = scmp.ne.s32.totalorder %s151_s12, %s236_s13  ;;  %p242_p4 = scmp.lt.s32.totalorder %s236_s13, %s236_s13 }
  0x2d   :  { %p243_p5 = por %p242_p4, %p241_p3 }
  0x2e   :  { %183 = vmatpush3.bf16.msra.mxu0 %v182_v7  ;;  %v47_v9 = vld [vmem:[#allocation2] sm:$0xf] }
  0x2f   :  { %p244_p6 = pnand %p243_p5, %p237_p2 }
  0x31   :  { %176 = vmatmul.mubr.msk.f32.vlgmr.msra.gmra.mrb[0].mxu0 %vm53_vm2, %v48_v8 }
 0x104   :  { %v123_v10 = vpop.f32.mrb[0].mxu0 }
 0x105   :  { %v127_v11 = vadd.f32 %v123_v10, %v47_v9  ;;  %v177_v12 = vpop.f32.mrb[1].mxu0 }
 0x107   :  { %129 = vst.msk [vmem:[#allocation2] sm:$0xf] %vm45_vm0, %v127_v11 }
 0x10e   :  { %v133_v14 = vld [vmem:[#allocation2] sm:$0xf] }
 0x10f   :  { %v141_v15 = vadd.f32 %v161_v13, %v133_v14 }
 0x111   :  { %v142_v16 = vmax.f32 %v141_v15, 0.0 }
 0x113   :  { %143 = vst.msk [vmem:[#allocation8] sm:$0xf] %vm45_vm0, %v142_v16 }
 0x114   :  { %247 = shalt.err (!%p244_p6)
}
 0x115   :  { %s248_s16 = scalar_lea.hbm %s344_s3, 64 }
 0x116   :  { %p249_p7 = scmp.ne.s32.totalorder %s344_s3, %s248_s16  ;;  %p252_p8 = scmp.lt.u32.totalorder %s248_s16, %s344_s3 }
 0x118   :  { %p254_p9 = pnand %p252_p8, %p249_p7 }
 0x11a   :  { %257 = shalt.err (!%p254_p9)
}
 0x11b   :  { %153 = dma.vmem_to_hbm [thread:$0]  %s151_s12, 64, %s344_s3, [#allocation5]  }
 0x11c   :  { %262 = dma.done.wait [#allocation5], 64  }
 0x11d   :  { %263 = vsyncadd [#allocation5], 4294967232 }
 0x11e   :  { %157 = vsyncpa [#allocation4], 1 }
 0x11f   :  { %158 = vsyncpa [#allocation7], 1 }
 0x120   :  { %159 = vsyncpa [#allocation5], 1 }

</bundles_post_ra>
